<compile_context>
chip_gen: v7x
topology: tpu7x:2x2x1
jax: 0.10.0
libtpu: 0.0.40
codegen_flags: <defaults>
</compile_context>

<pallas_src>
import jax
import jax.numpy as jnp
from jax.experimental import pallas as pl
from jax.experimental.pallas import tpu as pltpu

PATCH_SIZE = 8                      # kept for spec fidelity; numerically unused
_MIN_CHUNK_BYTES = 1 * 1024 * 1024  # don't split below ~1 MiB per DMA chunk
_MAX_INFLIGHT_DMAS = 4              # small ring of concurrent HBM->HBM DMAs


def _plan_chunks(leading_dim, bytes_per_slice):
    """Static (start, size) chunks along axis 0, at most _MAX_INFLIGHT_DMAS."""
    total = leading_dim * bytes_per_slice
    if leading_dim < 2 or total < 2 * _MIN_CHUNK_BYTES:
        return ((0, leading_dim),)
    nchunks = min(_MAX_INFLIGHT_DMAS, leading_dim,
                  max(1, total // _MIN_CHUNK_BYTES))
    base, rem = divmod(leading_dim, nchunks)
    chunks, start = [], 0
    for i in range(nchunks):
        size = base + (1 if i < rem else 0)
        chunks.append((start, size))
        start += size
    return tuple(chunks)


def _make_hbm_copy_kernel(chunks):
    """Kernel: copy x -> o entirely via HBM->HBM DMAs (no VMEM staging)."""

    def kernel(x_hbm, o_hbm, sem):
        copies = []
        for i, (start, size) in enumerate(chunks):
            cp = pltpu.make_async_copy(
                x_hbm.at[pl.ds(start, size)],
                o_hbm.at[pl.ds(start, size)],
                sem.at[i],
            )
            cp.start()                 # all chunks go in flight first ...
            copies.append(cp)
        for cp in copies:              # ... then drain them
            cp.wait()

    return kernel


@jax.jit
def edffn_forward(x):
    """JAX/Pallas equivalent of EDFFN.forward (NCHW input).

    EDFFN.forward is the identity, so in a real model the fastest choice is to
    return `x` unchanged (saving the full HBM read+write).  The Pallas call
    below is the cheapest materialized-copy form: chunked HBM->HBM DMA.
    """
    b, c, h, w = x.shape
    chunks = _plan_chunks(b, c * h * w * x.dtype.itemsize)
    nbytes = x.size * x.dtype.itemsize
    return pl.pallas_call(
        _make_hbm_copy_kernel(chunks),
        out_shape=jax.ShapeDtypeStruct(x.shape, x.dtype),
        in_specs=[pl.BlockSpec(memory_space=pl.ANY)],
        out_specs=pl.BlockSpec(memory_space=pl.ANY),
        scratch_shapes=[pltpu.SemaphoreType.DMA((len(chunks),))],
        cost_estimate=pl.CostEstimate(
            flops=0, transcendentals=0, bytes_accessed=2 * nbytes),
    )(x)


if __name__ == "__main__":
    key = jax.random.PRNGKey(0)
    k0, k1, k2 = jax.random.split(key, 3)

    # Main case: spatial size is a multiple of patch_size (single-DMA path).
    b, c, h, w = 2, 4, 16, 16
    x = jax.random.normal(k0, (b, c, h, w), dtype=jnp.float32)
    out = jax.block_until_ready(edffn_forward(x))
    assert out.shape == (b, c, h, w)
    assert out.dtype == x.dtype
    assert jnp.array_equal(out, x)

    # Non-multiple-of-8 spatial size: reference reflect-pads then crops back,
    # which is still the identity.
    b2, c2, h2, w2 = 2, 4, 13, 13
    x2 = jax.random.normal(k1, (b2, c2, h2, w2), dtype=jnp.float32)
    out2 = jax.block_until_ready(edffn_forward(x2))
    ref2 = jnp.pad(x2, ((0, 0), (0, 0), (0, 3), (0, 3)), mode="reflect")[:, :, :h2, :w2]
    assert out2.shape == (b2, c2, h2, w2)
    assert jnp.array_equal(out2, ref2)
    assert jnp.array_equal(out2, x2)

    # Larger case (4 MiB) exercising the multi-DMA chunked path (4 chunks).
    b3, c3, h3, w3 = 8, 16, 64, 128
    x3 = jax.random.normal(k2, (b3, c3, h3, w3), dtype=jnp.float32)
    out3 = jax.block_until_ready(edffn_forward(x3))
    assert jnp.array_equal(out3, x3)

    print("KERNEL_OK")
</pallas_src>

<mosaic_0001>
module attributes {stable_mosaic.version = 11 : i64} {
  func.func @kernel(%arg0: memref<2x4x16x16xf32, #tpu.memory_space<any>>, %arg1: memref<2x4x16x16xf32, #tpu.memory_space<any>>, %arg2: memref<1x!tpu.dma_semaphore, #tpu.memory_space<semaphore_mem>>) attributes {dimension_semantics = [], scalar_prefetch = 0 : i64, scratch_operands = 1 : i64, tpu.core_type = #tpu.core_type<tc>} {
    %c0_i32 = arith.constant 0 : i32
    %c0_i32_0 = arith.constant 0 : i32
    %c0_i32_1 = arith.constant 0 : i32
    %c0_i32_2 = arith.constant 0 : i32
    %c0_i32_3 = arith.constant 0 : i32
    %0 = tpu.memref_slice %arg0[%c0_i32_0, %c0_i32_1, %c0_i32_2, %c0_i32_3] : memref<2x4x16x16xf32, #tpu.memory_space<any>> -> memref<2x4x16x16xf32, #tpu.memory_space<any>>
    %c0_i32_4 = arith.constant 0 : i32
    %c0_i32_5 = arith.constant 0 : i32
    %c0_i32_6 = arith.constant 0 : i32
    %c0_i32_7 = arith.constant 0 : i32
    %1 = tpu.memref_slice %arg1[%c0_i32_4, %c0_i32_5, %c0_i32_6, %c0_i32_7] : memref<2x4x16x16xf32, #tpu.memory_space<any>> -> memref<2x4x16x16xf32, #tpu.memory_space<any>>
    %2 = tpu.memref_slice %arg2[%c0_i32] : memref<1x!tpu.dma_semaphore, #tpu.memory_space<semaphore_mem>> -> memref<1x!tpu.dma_semaphore, #tpu.memory_space<semaphore_mem>>
    %3 = tpu.memref_squeeze %2 : memref<1x!tpu.dma_semaphore, #tpu.memory_space<semaphore_mem>> -> memref<!tpu.dma_semaphore, #tpu.memory_space<semaphore_mem>>
    tpu.enqueue_dma source(%0 : memref<2x4x16x16xf32, #tpu.memory_space<any>>) target(%1 : memref<2x4x16x16xf32, #tpu.memory_space<any>>) target_semaphore(%3 : memref<!tpu.dma_semaphore, #tpu.memory_space<semaphore_mem>>)
    %c0_i32_8 = arith.constant 0 : i32
    %c0_i32_9 = arith.constant 0 : i32
    %c0_i32_10 = arith.constant 0 : i32
    %c0_i32_11 = arith.constant 0 : i32
    %c0_i32_12 = arith.constant 0 : i32
    %4 = tpu.memref_slice %arg0[%c0_i32_9, %c0_i32_10, %c0_i32_11, %c0_i32_12] : memref<2x4x16x16xf32, #tpu.memory_space<any>> -> memref<2x4x16x16xf32, #tpu.memory_space<any>>
    %c0_i32_13 = arith.constant 0 : i32
    %c0_i32_14 = arith.constant 0 : i32
    %c0_i32_15 = arith.constant 0 : i32
    %c0_i32_16 = arith.constant 0 : i32
    %5 = tpu.memref_slice %arg1[%c0_i32_13, %c0_i32_14, %c0_i32_15, %c0_i32_16] : memref<2x4x16x16xf32, #tpu.memory_space<any>> -> memref<2x4x16x16xf32, #tpu.memory_space<any>>
    %6 = tpu.memref_slice %arg2[%c0_i32_8] : memref<1x!tpu.dma_semaphore, #tpu.memory_space<semaphore_mem>> -> memref<1x!tpu.dma_semaphore, #tpu.memory_space<semaphore_mem>>
    %7 = tpu.memref_squeeze %6 : memref<1x!tpu.dma_semaphore, #tpu.memory_space<semaphore_mem>> -> memref<!tpu.dma_semaphore, #tpu.memory_space<semaphore_mem>>
    tpu.wait_dma2 semaphore(%7 : memref<!tpu.dma_semaphore, #tpu.memory_space<semaphore_mem>>) src(%4 : memref<2x4x16x16xf32, #tpu.memory_space<any>>) dst(%5 : memref<2x4x16x16xf32, #tpu.memory_space<any>>)
    return
  }
}

</mosaic_0001>

<bundles_post_ra>
// kernel: edffn_forward.1
= control target key start
LH: loop header
LB: loop body
LE: loop exit
PB: predicated region body
PF: predicated region fallthrough
CT: control target
= control target key end

     0   :  { %s36_s6 = smov [#allocation2]   ;;  %s37_s7 = smov [#allocation3]   ;;  %s55_s0 = inlined_call_operand.hbm [shape: f32[2,4,16,16], index: 0, kind: input, shape index: {}]   ;;  %s56_s1 = inlined_call_operand.hbm [shape: f32[2,4,16,16], index: 1, kind: output, shape index: {}]  }
   0x1   :  { %s38_s8 = smov 0  }
   0x2   :  { %18 = dma.general %s55_s0, 2048, %s56_s1, %s36_s6, %s37_s7, [#allocation4], %s38_s8, 0  }
   0x3   :  { %34 = dma.done.wait [#allocation2], 2048 }
   0x4   :  { %35 = vsyncadd [#allocation2], 4294965248 }
   0x5   :  { %24 = vsyncmov [#allocation2] }
   0x8   :  { %s25_s13 = vpop.sfrf %24 }
   0x9   :  { %p30_p0 = scmp.ne.s32.totalorder %s25_s13, 0 }
   0xb   :  { %29 = shalt.err (%p30_p0)  }

</bundles_post_ra>
